<compile_context>
chip_gen: v5e
topology: v5e:2x2
jax: 0.10.0
libtpu: 0.0.40
codegen_flags: <defaults>
</compile_context>

<pallas_src>
import jax
import jax.numpy as jnp
from jax.experimental import pallas as pl
from jax.experimental.pallas import tpu as pltpu

LANE = 128      # lane width (last-dim alignment)
SUBLANE = 8     # sublane width (second-to-last-dim alignment)


def _cdiv(a, b):
    return (a + b - 1) // b


def _round_up(a, m):
    return _cdiv(a, m) * m


def _vmem_capacity_bytes():
    """Generation-aware VMEM capacity (128 MiB v5e/v6e, 64 MiB v7x)."""
    try:
        return int(pltpu.get_tpu_info().vmem_capacity_bytes)
    except Exception:
        return 64 * 1024 * 1024   # conservative default (fits v7x)


# ---------------------------------------------------------------------------
# Kernels
# ---------------------------------------------------------------------------
def _mlp_kernel(x_ref, w1_ref, b1_ref, w2_ref, b2_ref, o_ref):
    """fc1 -> ReLU -> fc2 with the full weight matrices resident in VMEM."""
    x = x_ref[...].astype(w1_ref.dtype)                       # bf16 (or f32) MXU input
    h = jnp.dot(x, w1_ref[...], preferred_element_type=jnp.float32)
    h = jnp.maximum(h + b1_ref[...], 0.0)                     # bias + ReLU in f32
    out = jnp.dot(h.astype(w2_ref.dtype), w2_ref[...],
                  preferred_element_type=jnp.float32)
    o_ref[...] = (out + b2_ref[...]).astype(o_ref.dtype)


def _mlp_hidden_chunked_kernel(x_ref, w1_ref, b1_ref, w2_ref, b2_ref, o_ref,
                               acc_ref):
    """Fallback: hidden dim streamed in chunks, f32 accumulator for fc2."""
    j = pl.program_id(1)

    @pl.when(j == 0)
    def _init():
        acc_ref[...] = jnp.zeros_like(acc_ref)

    x = x_ref[...].astype(w1_ref.dtype)
    h = jnp.dot(x, w1_ref[...], preferred_element_type=jnp.float32)
    h = jnp.maximum(h + b1_ref[...], 0.0)
    acc_ref[...] += jnp.dot(h.astype(w2_ref.dtype), w2_ref[...],
                            preferred_element_type=jnp.float32)

    @pl.when(j == pl.num_programs(1) - 1)
    def _finalize():
        o_ref[...] = (acc_ref[...] + b2_ref[...]).astype(o_ref.dtype)


# ---------------------------------------------------------------------------
# Parameter preparation (pad + cast once, not per forward call)
# ---------------------------------------------------------------------------
def prepare_params(w1, b1, w2, b2, *, compute_dtype=jnp.bfloat16):
    """Pad feature dims to 128-lane multiples and cast weights for the MXU.

    Weights are (in, out) so the kernel computes x @ W + b (== PyTorch's
    x @ W.T with W of shape (out, in)).  Biases stay in float32.
    """
    in_size, hid = w1.shape
    out_size = w2.shape[1]
    in_p = _round_up(in_size, LANE)
    hid_p = _round_up(hid, LANE)
    out_p = _round_up(out_size, LANE)

    w1p = jnp.pad(w1, ((0, in_p - in_size), (0, hid_p - hid))).astype(compute_dtype)
    w2p = jnp.pad(w2, ((0, hid_p - hid), (0, out_p - out_size))).astype(compute_dtype)
    b1p = jnp.pad(b1.reshape(1, -1), ((0, 0), (0, hid_p - hid))).astype(jnp.float32)
    b2p = jnp.pad(b2.reshape(1, -1), ((0, 0), (0, out_p - out_size))).astype(jnp.float32)

    return dict(w1=w1p, b1=b1p, w2=w2p, b2=b2p,
                in_size=in_size, hid=hid, out_size=out_size)


# ---------------------------------------------------------------------------
# Forward
# ---------------------------------------------------------------------------
def _select_batch_tile(batch, fits, max_tile_m):
    """Largest VMEM-fitting TM, equalized tiles, >=2 steps for v7x megacore."""
    tm = min(_round_up(max(batch, 1), SUBLANE), _round_up(max_tile_m, SUBLANE))
    while tm > SUBLANE and not fits(tm):
        tm = max(_round_up(tm // 2, SUBLANE), SUBLANE)
    n_b = _cdiv(batch, tm)
    if n_b == 1 and batch >= 2 * SUBLANE:
        n_b = 2            # let the "parallel" batch axis use both v7x TensorCores
    tm = _round_up(_cdiv(batch, n_b), SUBLANE)   # equalize -> <8 rows of padding waste
    return tm, n_b


def neural_network_forward(x, params, *, max_tile_m=1024,
                           vmem_budget_bytes=None, force_hidden_chunks=None):
    """Fused fc1 -> ReLU -> fc2 on padded/pre-cast params from prepare_params."""
    w1p, b1p, w2p, b2p = params["w1"], params["b1"], params["w2"], params["b2"]
    in_size, out_size = params["in_size"], params["out_size"]
    batch = x.shape[0]
    assert x.shape[1] == in_size, "x feature dim must match fc1 in_features"

    in_p, hid_p = w1p.shape
    out_p = w2p.shape[1]
    x_item = jnp.dtype(x.dtype).itemsize
    w_item = jnp.dtype(w1p.dtype).itemsize

    capacity = _vmem_capacity_bytes()
    budget = vmem_budget_bytes if vmem_budget_bytes is not None else int(0.75 * capacity)

    # --- VMEM accounting (single-buffered resident weights, 2x-buffered I/O) ---
    def simple_bytes(tm):
        w = (in_p * hid_p + hid_p * out_p) * w_item + (hid_p + out_p) * 4
        io = 2 * tm * (in_p + out_p) * x_item                 # double-buffered x/out tiles
        sc = tm * hid_p * 4 + tm * (in_p + hid_p) * w_item    # f32 h + low-prec casts
        return w + io + sc

    def chunked_bytes(tm, th):
        w = 2 * ((in_p * th + th * out_p) * w_item + th * 4) + out_p * 4
        io = 2 * tm * (in_p + out_p) * x_item
        sc = tm * th * 4 + tm * out_p * 4 + tm * (in_p + th) * w_item
        return w + io + sc

    use_chunked = (force_hidden_chunks is not None) or (simple_bytes(SUBLANE) > budget)

    if not use_chunked:
        tm, n_b = _select_batch_tile(batch, lambda t: simple_bytes(t) <= budget,
                                     max_tile_m)
        th, n_h = hid_p, 1
        need = simple_bytes(tm)
    else:
        n_req = max(2, int(force_hidden_chunks or 2))
        th = _round_up(_cdiv(hid_p, n_req), LANE)
        while th > LANE and chunked_bytes(SUBLANE, th) > budget:
            n_req *= 2
            th = _round_up(_cdiv(hid_p, n_req), LANE)
        n_h = _cdiv(hid_p, th)
        tm, n_b = _select_batch_tile(batch, lambda t: chunked_bytes(t, th) <= budget,
                                     max_tile_m)
        need = chunked_bytes(tm, th)

    batch_p = n_b * tm
    hid_gp = n_h * th

    # Pad activations only when needed (weights were padded once at prepare time).
    if batch_p != batch or in_p != in_size:
        x_in = jnp.pad(x, ((0, batch_p - batch), (0, in_p - in_size)))
    else:
        x_in = x
    # Extra hidden padding only if the chunk size does not divide hid_p exactly.
    if hid_gp != hid_p:
        w1p = jnp.pad(w1p, ((0, 0), (0, hid_gp - hid_p)))
        b1p = jnp.pad(b1p, ((0, 0), (0, hid_gp - hid_p)))
        w2p = jnp.pad(w2p, ((0, hid_gp - hid_p), (0, 0)))

    # Never clamp the limit below the computed requirement; cap at physical VMEM.
    vmem_limit = int(min(capacity, max(int(need * 1.25) + (2 << 20), 32 << 20)))

    cost = pl.CostEstimate(
        flops=2 * batch_p * (in_p * hid_gp + hid_gp * out_p),
        transcendentals=0,
        bytes_accessed=int(x_in.size * x_item + (w1p.size + w2p.size) * w_item
                           + (b1p.size + b2p.size) * 4 + batch_p * out_p * x_item),
    )

    def run(resident_buffer_count):
        def rspec(shape, imap):
            if resident_buffer_count is None:
                return pl.BlockSpec(shape, imap)
            return pl.BlockSpec(shape, imap,
                                pipeline_mode=pl.Buffered(resident_buffer_count))

        if n_h == 1:
            grid = (n_b,)
            in_specs = [
                pl.BlockSpec((tm, in_p), lambda i: (i, 0)),       # x: streamed
                rspec((in_p, hid_gp), lambda i: (0, 0)),          # w1: resident
                rspec((1, hid_gp), lambda i: (0, 0)),             # b1: resident
                rspec((hid_gp, out_p), lambda i: (0, 0)),         # w2: resident
                rspec((1, out_p), lambda i: (0, 0)),              # b2: resident
            ]
            out_specs = pl.BlockSpec((tm, out_p), lambda i: (i, 0))
            scratch = ()
            kernel = _mlp_kernel
            semantics = ("parallel",)
        else:
            grid = (n_b, n_h)                                     # reduction axis last
            in_specs = [
                pl.BlockSpec((tm, in_p), lambda i, j: (i, 0)),    # x
                pl.BlockSpec((in_p, th), lambda i, j: (0, j)),    # w1 hidden chunk
                pl.BlockSpec((1, th), lambda i, j: (0, j)),       # b1 hidden chunk
                pl.BlockSpec((th, out_p), lambda i, j: (j, 0)),   # w2 hidden chunk
                rspec((1, out_p), lambda i, j: (0, 0)),           # b2: resident
            ]
            out_specs = pl.BlockSpec((tm, out_p), lambda i, j: (i, 0))
            scratch = (pltpu.VMEM((tm, out_p), jnp.float32),)
            kernel = _mlp_hidden_chunked_kernel
            semantics = ("parallel", "arbitrary")

        return pl.pallas_call(
            kernel,
            out_shape=jax.ShapeDtypeStruct((batch_p, out_p), x.dtype),
            grid_spec=pltpu.PrefetchScalarGridSpec(
                num_scalar_prefetch=0,
                grid=grid,
                in_specs=in_specs,
                out_specs=out_specs,
                scratch_shapes=scratch),
            compiler_params=pltpu.CompilerParams(
                dimension_semantics=semantics,
                vmem_limit_bytes=vmem_limit),
            cost_estimate=cost,
        )(x_in, w1p, b1p, w2p, b2p)

    try:
        out_padded = run(1)          # resident blocks single-buffered
    except Exception:                # pragma: no cover - fall back to default buffering
        out_padded = run(None)

    if batch_p != batch or out_p != out_size:
        return out_padded[:batch, :out_size]
    return out_padded


# ---------------------------------------------------------------------------
# PyTorch-style init and self-test
# ---------------------------------------------------------------------------
def init_params(key, input_size, hidden_size, output_size, dtype=jnp.float32):
    """Deterministic init mimicking nn.Linear (uniform +/- 1/sqrt(fan_in))."""
    k1, k2, k3, k4 = jax.random.split(key, 4)
    lim1 = 1.0 / (input_size ** 0.5)
    lim2 = 1.0 / (hidden_size ** 0.5)
    w1 = jax.random.uniform(k1, (input_size, hidden_size), dtype, -lim1, lim1)
    b1 = jax.random.uniform(k2, (1, hidden_size), dtype, -lim1, lim1)
    w2 = jax.random.uniform(k3, (hidden_size, output_size), dtype, -lim2, lim2)
    b2 = jax.random.uniform(k4, (1, output_size), dtype, -lim2, lim2)
    return w1, b1, w2, b2


if __name__ == "__main__":
    batch, input_size, hidden_size, output_size = 8, 32, 64, 16

    key = jax.random.PRNGKey(0)
    kx, kp = jax.random.split(key)
    x = jax.random.normal(kx, (batch, input_size), jnp.float32)
    w1, b1, w2, b2 = init_params(kp, input_size, hidden_size, output_size)
    ref = jnp.maximum(x @ w1 + b1, 0.0) @ w2 + b2

    # 1) Exact f32 path (weights resident, single grid axis).
    p_f32 = prepare_params(w1, b1, w2, b2, compute_dtype=jnp.float32)
    out_f32 = jax.block_until_ready(neural_network_forward(x, p_f32))
    assert out_f32.shape == (batch, output_size)
    assert jnp.allclose(out_f32, ref, atol=1e-5, rtol=1e-5)

    # 2) Default bf16-MXU path (f32 accumulation; looser tolerance vs f32 ref).
    p_bf16 = prepare_params(w1, b1, w2, b2)
    out_bf16 = jax.block_until_ready(neural_network_forward(x, p_bf16))
    assert jnp.allclose(out_bf16, ref, atol=5e-2, rtol=5e-2)

    # 3) Hidden-chunked fallback path (accumulator + pl.when init/finalize).
    hidden_big = 256
    w1b, b1b, w2b, b2b = init_params(kp, input_size, hidden_big, output_size)
    ref_b = jnp.maximum(x @ w1b + b1b, 0.0) @ w2b + b2b
    p_chunk = prepare_params(w1b, b1b, w2b, b2b, compute_dtype=jnp.float32)
    out_chunk = jax.block_until_ready(
        neural_network_forward(x, p_chunk, force_hidden_chunks=2))
    assert jnp.allclose(out_chunk, ref_b, atol=1e-5, rtol=1e-5)

    print("KERNEL_OK")
</pallas_src>

<mosaic_0001>
module attributes {stable_mosaic.version = 11 : i64} {
  func.func @_mlp_kernel(%arg0: i32, %arg1: memref<8x128xf32, #tpu.memory_space<vmem>>, %arg2: memref<128x128xf32, #tpu.memory_space<vmem>>, %arg3: memref<1x128xf32, #tpu.memory_space<vmem>>, %arg4: memref<128x128xf32, #tpu.memory_space<vmem>>, %arg5: memref<1x128xf32, #tpu.memory_space<vmem>>, %arg6: memref<8x128xf32, #tpu.memory_space<vmem>>) attributes {dimension_semantics = [#tpu.dimension_semantics<parallel>], iteration_bounds = array<i64: 1>, scalar_prefetch = 0 : i64, scratch_operands = 0 : i64, tpu.core_type = #tpu.core_type<tc>, window_params = [{transform_indices = @transform_0, window_bounds = array<i64: 8, 128>}, {pipeline_mode = #tpu.pipeline_mode<synchronous>, transform_indices = @transform_1, window_bounds = array<i64: 128, 128>}, {pipeline_mode = #tpu.pipeline_mode<synchronous>, transform_indices = @transform_2, window_bounds = array<i64: 1, 128>}, {pipeline_mode = #tpu.pipeline_mode<synchronous>, transform_indices = @transform_3, window_bounds = array<i64: 128, 128>}, {pipeline_mode = #tpu.pipeline_mode<synchronous>, transform_indices = @transform_4, window_bounds = array<i64: 1, 128>}, {transform_indices = @transform_5, window_bounds = array<i64: 8, 128>}]} {
    %c0 = arith.constant 0 : index
    %c0_0 = arith.constant 0 : index
    %0 = vector.load %arg1[%c0, %c0_0] : memref<8x128xf32, #tpu.memory_space<vmem>>, vector<8x128xf32>
    %c0_1 = arith.constant 0 : index
    %c0_2 = arith.constant 0 : index
    %1 = vector.load %arg2[%c0_1, %c0_2] : memref<128x128xf32, #tpu.memory_space<vmem>>, vector<128x128xf32>
    %cst = arith.constant dense<0.000000e+00> : vector<8x128xf32>
    %2 = tpu.matmul %0, %1, %cst {dimension_numbers = #tpu.dot_dimension_numbers<[1], [0], [0], [1], [0, 0, 1, 1], [], []>} : vector<8x128xf32>, vector<128x128xf32>, vector<8x128xf32> -> vector<8x128xf32>
    %c0_3 = arith.constant 0 : index
    %c0_4 = arith.constant 0 : index
    %3 = vector.load %arg3[%c0_3, %c0_4] : memref<1x128xf32, #tpu.memory_space<vmem>>, vector<1x128xf32>
    %4 = vector.broadcast %3 : vector<1x128xf32> to vector<8x128xf32>
    %5 = arith.addf %2, %4 : vector<8x128xf32>
    %cst_5 = arith.constant 0.000000e+00 : f32
    %6 = vector.broadcast %cst_5 : f32 to vector<8x128xf32>
    %7 = arith.maximumf %5, %6 : vector<8x128xf32>
    %c0_6 = arith.constant 0 : index
    %c0_7 = arith.constant 0 : index
    %8 = vector.load %arg4[%c0_6, %c0_7] : memref<128x128xf32, #tpu.memory_space<vmem>>, vector<128x128xf32>
    %cst_8 = arith.constant dense<0.000000e+00> : vector<8x128xf32>
    %9 = tpu.matmul %7, %8, %cst_8 {dimension_numbers = #tpu.dot_dimension_numbers<[1], [0], [0], [1], [0, 0, 1, 1], [], []>} : vector<8x128xf32>, vector<128x128xf32>, vector<8x128xf32> -> vector<8x128xf32>
    %c0_9 = arith.constant 0 : index
    %c0_10 = arith.constant 0 : index
    %10 = vector.load %arg5[%c0_9, %c0_10] : memref<1x128xf32, #tpu.memory_space<vmem>>, vector<1x128xf32>
    %11 = vector.broadcast %10 : vector<1x128xf32> to vector<8x128xf32>
    %12 = arith.addf %9, %11 : vector<8x128xf32>
    %c0_11 = arith.constant 0 : index
    %c0_12 = arith.constant 0 : index
    %13 = vector.load %arg6[%c0_11, %c0_12] : memref<8x128xf32, #tpu.memory_space<vmem>>, vector<8x128xf32>
    tpu.vector_store %arg6[%c0_11, %c0_12], %12 {strides = array<i32>} : memref<8x128xf32, #tpu.memory_space<vmem>>, vector<8x128xf32>,
    return
  }
  func.func @transform_0(%arg0: i32) -> (i32, i32) {
    %c0_i32 = arith.constant 0 : i32
    %c0_i32_0 = arith.constant 0 : i32
    return %arg0, %c0_i32 : i32, i32
  }
  func.func @transform_1(%arg0: i32) -> (i32, i32) {
    %c0_i32 = arith.constant 0 : i32
    %c0_i32_0 = arith.constant 0 : i32
    %c0_i32_1 = arith.constant 0 : i32
    return %c0_i32, %c0_i32_0 : i32, i32
  }
  func.func @transform_2(%arg0: i32) -> (i32, i32) {
    %c0_i32 = arith.constant 0 : i32
    %c0_i32_0 = arith.constant 0 : i32
    %c0_i32_1 = arith.constant 0 : i32
    return %c0_i32, %c0_i32_0 : i32, i32
  }
  func.func @transform_3(%arg0: i32) -> (i32, i32) {
    %c0_i32 = arith.constant 0 : i32
    %c0_i32_0 = arith.constant 0 : i32
    %c0_i32_1 = arith.constant 0 : i32
    return %c0_i32, %c0_i32_0 : i32, i32
  }
  func.func @transform_4(%arg0: i32) -> (i32, i32) {
    %c0_i32 = arith.constant 0 : i32
    %c0_i32_0 = arith.constant 0 : i32
    %c0_i32_1 = arith.constant 0 : i32
    return %c0_i32, %c0_i32_0 : i32, i32
  }
  func.func @transform_5(%arg0: i32) -> (i32, i32) {
    %c0_i32 = arith.constant 0 : i32
    %c0_i32_0 = arith.constant 0 : i32
    return %arg0, %c0_i32 : i32, i32
  }
}

module attributes {stable_mosaic.version = 11 : i64} {
  func.func @_mlp_kernel(%arg0: i32, %arg1: memref<8x128xf32, #tpu.memory_space<vmem>>, %arg2: memref<128x128xf32, #tpu.memory_space<vmem>>, %arg3: memref<1x128xf32, #tpu.memory_space<vmem>>, %arg4: memref<128x128xf32, #tpu.memory_space<vmem>>, %arg5: memref<1x128xf32, #tpu.memory_space<vmem>>, %arg6: memref<8x128xf32, #tpu.memory_space<vmem>>) attributes {dimension_semantics = [#tpu.dimension_semantics<parallel>], iteration_bounds = array<i64: 1>, scalar_prefetch = 0 : i64, scratch_operands = 0 : i64, tpu.core_type = #tpu.core_type<tc>, window_params = [{transform_indices = @transform_0, window_bounds = array<i64: 8, 128>}, {pipeline_mode = #tpu.pipeline_mode<synchronous>, transform_indices = @transform_1, window_bounds = array<i64: 128, 128>}, {pipeline_mode = #tpu.pipeline_mode<synchronous>, transform_indices = @transform_2, window_bounds = array<i64: 1, 128>}, {pipeline_mode = #tpu.pipeline_mode<synchronous>, transform_indices = @transform_3, window_bounds = array<i64: 128, 128>}, {pipeline_mode = #tpu.pipeline_mode<synchronous>, transform_indices = @transform_4, window_bounds = array<i64: 1, 128>}, {transform_indices = @transform_5, window_bounds = array<i64: 8, 128>}]} {
    %c0 = arith.constant 0 : index
    %c0_0 = arith.constant 0 : index
    %0 = vector.load %arg1[%c0, %c0_0] : memref<8x128xf32, #tpu.memory_space<vmem>>, vector<8x128xf32>
    %c0_1 = arith.constant 0 : index
    %c0_2 = arith.constant 0 : index
    %1 = vector.load %arg2[%c0_1, %c0_2] : memref<128x128xf32, #tpu.memory_space<vmem>>, vector<128x128xf32>
    %cst = arith.constant dense<0.000000e+00> : vector<8x128xf32>
    %2 = tpu.matmul %0, %1, %cst {dimension_numbers = #tpu.dot_dimension_numbers<[1], [0], [0], [1], [0, 0, 1, 1], [], []>} : vector<8x128xf32>, vector<128x128xf32>, vector<8x128xf32> -> vector<8x128xf32>
    %c0_3 = arith.constant 0 : index
    %c0_4 = arith.constant 0 : index
    %3 = vector.load %arg3[%c0_3, %c0_4] : memref<1x128xf32, #tpu.memory_space<vmem>>, vector<1x128xf32>
    %4 = vector.broadcast %3 : vector<1x128xf32> to vector<8x128xf32>
    %5 = arith.addf %2, %4 : vector<8x128xf32>
    %cst_5 = arith.constant 0.000000e+00 : f32
    %6 = vector.broadcast %cst_5 : f32 to vector<8x128xf32>
    %7 = arith.maximumf %5, %6 : vector<8x128xf32>
    %c0_6 = arith.constant 0 : index
    %c0_7 = arith.constant 0 : index
    %8 = vector.load %arg4[%c0_6, %c0_7] : memref<128x128xf32, #tpu.memory_space<vmem>>, vector<128x128xf32>
    %cst_8 = arith.constant dense<0.000000e+00> : vector<8x128xf32>
    %9 = tpu.matmul %7, %8, %cst_8 {dimension_numbers = #tpu.dot_dimension_numbers<[1], [0], [0], [1], [0, 0, 1, 1], [], []>} : vector<8x128xf32>, vector<128x128xf32>, vector<8x128xf32> -> vector<8x128xf32>
    %c0_9 = arith.constant 0 : index
    %c0_10 = arith.constant 0 : index
    %10 = vector.load %arg5[%c0_9, %c0_10] : memref<1x128xf32, #tpu.memory_space<vmem>>, vector<1x128xf32>
    %11 = vector.broadcast %10 : vector<1x128xf32> to vector<8x128xf32>
    %12 = arith.addf %9, %11 : vector<8x128xf32>
    %c0_11 = arith.constant 0 : index
    %c0_12 = arith.constant 0 : index
    %13 = vector.load %arg6[%c0_11, %c0_12] : memref<8x128xf32, #tpu.memory_space<vmem>>, vector<8x128xf32>
    tpu.vector_store %arg6[%c0_11, %c0_12], %12 {strides = array<i32>} : memref<8x128xf32, #tpu.memory_space<vmem>>, vector<8x128xf32>,
    return
  }
  func.func @transform_0(%arg0: i32) -> (i32, i32) {
    %c0_i32 = arith.constant 0 : i32
    %c0_i32_0 = arith.constant 0 : i32
    return %arg0, %c0_i32 : i32, i32
  }
  func.func @transform_1(%arg0: i32) -> (i32, i32) {
    %c0_i32 = arith.constant 0 : i32
    %c0_i32_0 = arith.constant 0 : i32
    %c0_i32_1 = arith.constant 0 : i32
    return %c0_i32, %c0_i32_0 : i32, i32
  }
  func.func @transform_2(%arg0: i32) -> (i32, i32) {
    %c0_i32 = arith.constant 0 : i32
    %c0_i32_0 = arith.constant 0 : i32
    %c0_i32_1 = arith.constant 0 : i32
    return %c0_i32, %c0_i32_0 : i32, i32
  }
  func.func @transform_3(%arg0: i32) -> (i32, i32) {
    %c0_i32 = arith.constant 0 : i32
    %c0_i32_0 = arith.constant 0 : i32
    %c0_i32_1 = arith.constant 0 : i32
    return %c0_i32, %c0_i32_0 : i32, i32
  }
  func.func @transform_4(%arg0: i32) -> (i32, i32) {
    %c0_i32 = arith.constant 0 : i32
    %c0_i32_0 = arith.constant 0 : i32
    %c0_i32_1 = arith.constant 0 : i32
    return %c0_i32, %c0_i32_0 : i32, i32
  }
  func.func @transform_5(%arg0: i32) -> (i32, i32) {
    %c0_i32 = arith.constant 0 : i32
    %c0_i32_0 = arith.constant 0 : i32
    return %arg0, %c0_i32 : i32, i32
  }
}

</mosaic_0001>

<bundles_post_ra>
// kernel: tpu_custom_call.1
= control target key start
LH: loop header
LB: loop body
LE: loop exit
PB: predicated region body
PF: predicated region fallthrough
CT: control target
= control target key end

     0   :  { %10 = vsyncpa [#allocation3], 0  ;;  %s331_s0 = inlined_call_operand.hbm [shape: f32[8,128], index: 0, kind: input, shape index: {}]   ;;  %s332_s1 = inlined_call_operand.hbm [shape: f32[128,128], index: 1, kind: input, shape index: {}]   ;;  %s333_s2 = inlined_call_operand.vmem [shape: f32[1,128], index: 2, kind: input, shape index: {}]   ;;  %s334_s3 = inlined_call_operand.hbm [shape: f32[128,128], index: 3, kind: input, shape index: {}]   ;;  %s335_s4 = inlined_call_operand.vmem [shape: f32[1,128], index: 4, kind: input, shape index: {}]   ;;  %s336_s5 = inlined_call_operand.hbm [shape: f32[8,128], index: 5, kind: output, shape index: {}]  }
   0x1   :  { %11 = vsyncpa [#allocation6], 0  ;;  %s28_s20 = sshll.u32 %s332_s1, 4  ;;  %s29_s20 = int_to_ptr.hbm [resolvable:$true] %s28_s20 }
   0x2   :  { %12 = vsyncpa [#allocation4], 0  ;;  %s277_s21 = smov [#allocation5]   ;;  %s18_s25 = sshll.u32 %s331_s0, 4  ;;  %s19_s25 = int_to_ptr.hbm [resolvable:$true] %s18_s25 }
   0x3   :  { %s30_s22 = sshll.u32 %s277_s21, 4  ;;  %s278_s26 = smov 128   ;;  %s31_s22 = int_to_ptr.vmem [resolvable:$true] %s30_s22 }
   0x4   :  { %s279_s27 = smov 8   ;;  %s280_s28 = smov [#allocation2]  }
   0x5   :  { %36 = dma.hbm_to_vmem [thread:$0]  %s29_s20, 2048, %s31_s22, [#allocation6], %s278_s26, %s278_s26, %s279_s27  }
   0x6   :  { %s20_s29 = sshll.u32 %s280_s28, 4  ;;  %s43_s7 = sshll.u32 %s334_s3, 4  ;;  %s21_s29 = int_to_ptr.vmem [resolvable:$true] %s20_s29  ;;  %s44_s7 = int_to_ptr.hbm [resolvable:$true] %s43_s7 }
   0x7   :  { %23 = dma.hbm_to_vmem [thread:$0]  %s19_s25, 128, %s21_s29, [#allocation3]  }
   0x8   :  { %s281_s1 = smov [#allocation7]  }
   0x9   :  { %s45_s8 = sshll.u32 %s281_s1, 4  ;;  %s46_s8 = int_to_ptr.vmem [resolvable:$true] %s45_s8 }
   0xa   :  { %51 = dma.hbm_to_vmem [thread:$0]  %s44_s7, 2048, %s46_s8, [#allocation6], %s278_s26, %s278_s26, %s279_s27  }
   0xb   :  { %271 = dma.done.wait [#allocation3], 128  }
   0xc   :  { %272 = vsyncadd [#allocation3], 4294967168 }
   0xd   :  { %273 = dma.done.wait [#allocation6], 4096  }
   0xe   :  { %274 = vsyncadd [#allocation6], 4294963200  ;;  %v82_v0 = vld [vmem:[#allocation5 + $0x78] sm:$0xff]  ;;  %v81_v1 = vld [vmem:[#allocation5 + $0x70] sm:$0xff]  ;;  %s282_s11 = smov [#allocation8]   ;;  %s156_s15 = sshll.u32 %s336_s5, 4  ;;  %s157_s15 = int_to_ptr.hbm [resolvable:$true] %s156_s15 }
   0xf   :  { %87 = vmatpush.msra.mxu0 %v82_v0  ;;  %v80_v2 = vld [vmem:[#allocation5 + $0x68] sm:$0xff]  ;;  %v79_v3 = vld [vmem:[#allocation5 + $0x60] sm:$0xff]  ;;  %v123_v4 = vld [vmem:[#allocation7 + $0x78] sm:$0xff]  ;;  %s154_s12 = sshll.u32 %s282_s11, 4  ;;  %s155_s12 = int_to_ptr.vmem [resolvable:$true] %s154_s12 }
  0x10   :  { %v78_v5 = vld [vmem:[#allocation5 + $0x58] sm:$0xff]  ;;  %128 = vmatpush.msra.mxu1 %v123_v4  ;;  %v122_v6 = vld [vmem:[#allocation7 + $0x70] sm:$0xff]  ;;  %v121_v7 = vld [vmem:[#allocation7 + $0x68] sm:$0xff] }
  0x11   :  { %88 = vmatpush.msra.mxu0 %v81_v1  ;;  %v77_v8 = vld [vmem:[#allocation5 + $0x50] sm:$0xff]  ;;  %v120_v9 = vld [vmem:[#allocation7 + $0x60] sm:$0xff]  ;;  %v76_v10 = vld [vmem:[#allocation5 + $0x48] sm:$0xff] }
  0x12   :  { %129 = vmatpush.msra.mxu1 %v122_v6  ;;  %v119_v11 = vld [vmem:[#allocation7 + $0x58] sm:$0xff]  ;;  %v75_v12 = vld [vmem:[#allocation5 + $0x40] sm:$0xff]  ;;  %v118_v13 = vld [vmem:[#allocation7 + $0x50] sm:$0xff] }
  0x13   :  { %89 = vmatpush.msra.mxu0 %v80_v2  ;;  %v74_v14 = vld [vmem:[#allocation5 + $0x38] sm:$0xff]  ;;  %v117_v15 = vld [vmem:[#allocation7 + $0x48] sm:$0xff]  ;;  %v73_v16 = vld [vmem:[#allocation5 + $0x30] sm:$0xff] }
  0x14   :  { %130 = vmatpush.msra.mxu1 %v121_v7  ;;  %v116_v17 = vld [vmem:[#allocation7 + $0x40] sm:$0xff]  ;;  %v72_v18 = vld [vmem:[#allocation5 + $0x28] sm:$0xff]  ;;  %v115_v19 = vld [vmem:[#allocation7 + $0x38] sm:$0xff] }
  0x15   :  { %90 = vmatpush.msra.mxu0 %v79_v3  ;;  %v71_v20 = vld [vmem:[#allocation5 + $0x20] sm:$0xff]  ;;  %v114_v21 = vld [vmem:[#allocation7 + $0x30] sm:$0xff]  ;;  %v70_v22 = vld [vmem:[#allocation5 + $0x18] sm:$0xff] }
  0x16   :  { %131 = vmatpush.msra.mxu1 %v120_v9  ;;  %v113_v23 = vld [vmem:[#allocation7 + $0x28] sm:$0xff]  ;;  %v69_v24 = vld [vmem:[#allocation5 + $0x10] sm:$0xff]  ;;  %v112_v25 = vld [vmem:[#allocation7 + $0x20] sm:$0xff] }
  0x17   :  { %91 = vmatpush.msra.mxu0 %v78_v5  ;;  %v68_v26 = vld [vmem:[#allocation5 + $0x8] sm:$0xff]  ;;  %v111_v27 = vld [vmem:[#allocation7 + $0x18] sm:$0xff]  ;;  %v67_v28 = vld [vmem:[#allocation5] sm:$0xff] }
  0x18   :  { %132 = vmatpush.msra.mxu1 %v119_v11  ;;  %v66_v29 = vld [vmem:[#allocation2] sm:$0xff]  ;;  %v110_v30 = vld [vmem:[#allocation7 + $0x10] sm:$0xff]  ;;  %v109_v31 = vld [vmem:[#allocation7 + $0x8] sm:$0xff] }
  0x19   :  { %92 = vmatpush.msra.mxu0 %v77_v8  ;;  %v108_v32 = vld [vmem:[#allocation7] sm:$0xff]  ;;  %v173_v33 = vld [vmem:[%s333_s2] ss:$0 sm:$0xff] }
  0x1a   :  { %133 = vmatpush.msra.mxu1 %v118_v13  ;;  %v174_v37 = vld [vmem:[%s335_s4] ss:$0 sm:$0xff] }
  0x1b   :  { %93 = vmatpush.msra.mxu0 %v76_v10 }
  0x1c   :  { %134 = vmatpush.msra.mxu1 %v117_v15 }
  0x1d   :  { %94 = vmatpush.msra.mxu0 %v75_v12 }
  0x1e   :  { %135 = vmatpush.msra.mxu1 %v116_v17 }
  0x1f   :  { %95 = vmatpush.msra.mxu0 %v74_v14 }
  0x20   :  { %136 = vmatpush.msra.mxu1 %v115_v19 }
  0x21   :  { %96 = vmatpush.msra.mxu0 %v73_v16 }
  0x22   :  { %137 = vmatpush.msra.mxu1 %v114_v21 }
  0x23   :  { %97 = vmatpush.msra.mxu0 %v72_v18 }
  0x24   :  { %138 = vmatpush.msra.mxu1 %v113_v23 }
  0x25   :  { %98 = vmatpush.msra.mxu0 %v71_v20 }
  0x26   :  { %139 = vmatpush.msra.mxu1 %v112_v25 }
  0x27   :  { %99 = vmatpush.msra.mxu0 %v70_v22 }
  0x28   :  { %140 = vmatpush.msra.mxu1 %v111_v27 }
  0x29   :  { %100 = vmatpush.msra.mxu0 %v69_v24 }
  0x2a   :  { %141 = vmatpush.msra.mxu1 %v110_v30 }
  0x2b   :  { %101 = vmatpush.msra.mxu0 %v68_v26 }
  0x2c   :  { %142 = vmatpush.msra.mxu1 %v109_v31 }
  0x2d   :  { %102 = vmatpush.msra.mxu0 %v67_v28 }
  0x2e   :  { %103 = vmatmul.f32.vlgmr.msra.gmra.mxu0 %v66_v29  ;;  %143 = vmatpush.msra.mxu1 %v108_v32 }
  0xab   :  { %v104_v34 = vpop.f32.mrf.mxu0 }
  0xac   :  { %v105_v35 = vadd.f32 %v173_v33, %v104_v34 }
  0xae   :  { %v107_v36 = vmax.f32 %v105_v35, 0.0 }
  0xb0   :  { %144 = vmatmul.f32.vlgmr.msra.gmra.mxu1 %v107_v36 }
 0x12d   :  { %v145_v38 = vpop.f32.mrf.mxu1 }
 0x12e   :  { %v146_v39 = vadd.f32 %v174_v37, %v145_v38 }
 0x130   :  { %148 = vst [vmem:[#allocation8] sm:$0xff] %v146_v39 }
 0x131   :  { %159 = dma.vmem_to_hbm [thread:$0]  %s155_s12, 128, %s157_s15, [#allocation4]  }
 0x132   :  { %275 = dma.done.wait [#allocation4], 128  }
 0x133   :  { %276 = vsyncadd [#allocation4], 4294967168 }
 0x134   :  { %164 = vsyncpa [#allocation3], 1 }
 0x135   :  { %165 = vsyncpa [#allocation6], 1 }
 0x136   :  { %166 = vsyncpa [#allocation4], 1 }

// kernel: tpu_custom_call.1
= control target key start
LH: loop header
LB: loop body
LE: loop exit
PB: predicated region body
PF: predicated region fallthrough
CT: control target
= control target key end

     0   :  { %10 = vsyncpa [#allocation3], 0  ;;  %s331_s0 = inlined_call_operand.hbm [shape: f32[8,128], index: 0, kind: input, shape index: {}]   ;;  %s332_s1 = inlined_call_operand.hbm [shape: f32[128,128], index: 1, kind: input, shape index: {}]   ;;  %s333_s2 = inlined_call_operand.vmem [shape: f32[1,128], index: 2, kind: input, shape index: {}]   ;;  %s334_s3 = inlined_call_operand.hbm [shape: f32[128,128], index: 3, kind: input, shape index: {}]   ;;  %s335_s4 = inlined_call_operand.vmem [shape: f32[1,128], index: 4, kind: input, shape index: {}]   ;;  %s336_s5 = inlined_call_operand.hbm [shape: f32[8,128], index: 5, kind: output, shape index: {}]  }
   0x1   :  { %11 = vsyncpa [#allocation6], 0  ;;  %s28_s20 = sshll.u32 %s332_s1, 4  ;;  %s29_s20 = int_to_ptr.hbm [resolvable:$true] %s28_s20 }
   0x2   :  { %12 = vsyncpa [#allocation4], 0  ;;  %s277_s21 = smov [#allocation5]   ;;  %s18_s25 = sshll.u32 %s331_s0, 4  ;;  %s19_s25 = int_to_ptr.hbm [resolvable:$true] %s18_s25 }
   0x3   :  { %s30_s22 = sshll.u32 %s277_s21, 4  ;;  %s278_s26 = smov 128   ;;  %s31_s22 = int_to_ptr.vmem [resolvable:$true] %s30_s22 }
   0x4   :  { %s279_s27 = smov 8   ;;  %s280_s28 = smov [#allocation2]  }
   0x5   :  { %36 = dma.hbm_to_vmem [thread:$0]  %s29_s20, 2048, %s31_s22, [#allocation6], %s278_s26, %s278_s26, %s279_s27  }
   0x6   :  { %s20_s29 = sshll.u32 %s280_s28, 4  ;;  %s43_s7 = sshll.u32 %s334_s3, 4  ;;  %s21_s29 = int_to_ptr.vmem [resolvable:$true] %s20_s29  ;;  %s44_s7 = int_to_ptr.hbm [resolvable:$true] %s43_s7 }
   0x7   :  { %23 = dma.hbm_to_vmem [thread:$0]  %s19_s25, 128, %s21_s29, [#allocation3]  }
   0x8   :  { %s281_s1 = smov [#allocation7]  }
   0x9   :  { %s45_s8 = sshll.u32 %s281_s1, 4  ;;  %s46_s8 = int_to_ptr.vmem [resolvable:$true] %s45_s8 }
   0xa   :  { %51 = dma.hbm_to_vmem [thread:$0]  %s44_s7, 2048, %s46_s8, [#allocation6], %s278_s26, %s278_s26, %s279_s27  }
   0xb   :  { %271 = dma.done.wait [#allocation3], 128  }
   0xc   :  { %272 = vsyncadd [#allocation3], 4294967168 }
   0xd   :  { %273 = dma.done.wait [#allocation6], 4096  }
   0xe   :  { %274 = vsyncadd [#allocation6], 4294963200  ;;  %v82_v0 = vld [vmem:[#allocation5 + $0x78] sm:$0xff]  ;;  %v81_v1 = vld [vmem:[#allocation5 + $0x70] sm:$0xff]  ;;  %s282_s11 = smov [#allocation8]   ;;  %s156_s15 = sshll.u32 %s336_s5, 4  ;;  %s157_s15 = int_to_ptr.hbm [resolvable:$true] %s156_s15 }
   0xf   :  { %87 = vmatpush.msra.mxu0 %v82_v0  ;;  %v80_v2 = vld [vmem:[#allocation5 + $0x68] sm:$0xff]  ;;  %v79_v3 = vld [vmem:[#allocation5 + $0x60] sm:$0xff]  ;;  %v123_v4 = vld [vmem:[#allocation7 + $0x78] sm:$0xff]  ;;  %s154_s12 = sshll.u32 %s282_s11, 4  ;;  %s155_s12 = int_to_ptr.vmem [resolvable:$true] %s154_s12 }
  0x10   :  { %v78_v5 = vld [vmem:[#allocation5 + $0x58] sm:$0xff]  ;;  %128 = vmatpush.msra.mxu1 %v123_v4  ;;  %v122_v6 = vld [vmem:[#allocation7 + $0x70] sm:$0xff]  ;;  %v121_v7 = vld [vmem:[#allocation7 + $0x68] sm:$0xff] }
  0x11   :  { %88 = vmatpush.msra.mxu0 %v81_v1  ;;  %v77_v8 = vld [vmem:[#allocation5 + $0x50] sm:$0xff]  ;;  %v120_v9 = vld [vmem:[#allocation7 + $0x60] sm:$0xff]  ;;  %v76_v10 = vld [vmem:[#allocation5 + $0x48] sm:$0xff] }
  0x12   :  { %129 = vmatpush.msra.mxu1 %v122_v6  ;;  %v119_v11 = vld [vmem:[#allocation7 + $0x58] sm:$0xff]  ;;  %v75_v12 = vld [vmem:[#allocation5 + $0x40] sm:$0xff]  ;;  %v118_v13 = vld [vmem:[#allocation7 + $0x50] sm:$0xff] }
  0x13   :  { %89 = vmatpush.msra.mxu0 %v80_v2  ;;  %v74_v14 = vld [vmem:[#allocation5 + $0x38] sm:$0xff]  ;;  %v117_v15 = vld [vmem:[#allocation7 + $0x48] sm:$0xff]  ;;  %v73_v16 = vld [vmem:[#allocation5 + $0x30] sm:$0xff] }
  0x14   :  { %130 = vmatpush.msra.mxu1 %v121_v7  ;;  %v116_v17 = vld [vmem:[#allocation7 + $0x40] sm:$0xff]  ;;  %v72_v18 = vld [vmem:[#allocation5 + $0x28] sm:$0xff]  ;;  %v115_v19 = vld [vmem:[#allocation7 + $0x38] sm:$0xff] }
  0x15   :  { %90 = vmatpush.msra.mxu0 %v79_v3  ;;  %v71_v20 = vld [vmem:[#allocation5 + $0x20] sm:$0xff]  ;;  %v114_v21 = vld [vmem:[#allocation7 + $0x30] sm:$0xff]  ;;  %v70_v22 = vld [vmem:[#allocation5 + $0x18] sm:$0xff] }
  0x16   :  { %131 = vmatpush.msra.mxu1 %v120_v9  ;;  %v113_v23 = vld [vmem:[#allocation7 + $0x28] sm:$0xff]  ;;  %v69_v24 = vld [vmem:[#allocation5 + $0x10] sm:$0xff]  ;;  %v112_v25 = vld [vmem:[#allocation7 + $0x20] sm:$0xff] }
  0x17   :  { %91 = vmatpush.msra.mxu0 %v78_v5  ;;  %v68_v26 = vld [vmem:[#allocation5 + $0x8] sm:$0xff]  ;;  %v111_v27 = vld [vmem:[#allocation7 + $0x18] sm:$0xff]  ;;  %v67_v28 = vld [vmem:[#allocation5] sm:$0xff] }
  0x18   :  { %132 = vmatpush.msra.mxu1 %v119_v11  ;;  %v66_v29 = vld [vmem:[#allocation2] sm:$0xff]  ;;  %v110_v30 = vld [vmem:[#allocation7 + $0x10] sm:$0xff]  ;;  %v109_v31 = vld [vmem:[#allocation7 + $0x8] sm:$0xff] }
  0x19   :  { %92 = vmatpush.msra.mxu0 %v77_v8  ;;  %v108_v32 = vld [vmem:[#allocation7] sm:$0xff]  ;;  %v173_v33 = vld [vmem:[%s333_s2] ss:$0 sm:$0xff] }
  0x1a   :  { %133 = vmatpush.msra.mxu1 %v118_v13  ;;  %v174_v37 = vld [vmem:[%s335_s4] ss:$0 sm:$0xff] }
  0x1b   :  { %93 = vmatpush.msra.mxu0 %v76_v10 }
  0x1c   :  { %134 = vmatpush.msra.mxu1 %v117_v15 }
  0x1d   :  { %94 = vmatpush.msra.mxu0 %v75_v12 }
  0x1e   :  { %135 = vmatpush.msra.mxu1 %v116_v17 }
  0x1f   :  { %95 = vmatpush.msra.mxu0 %v74_v14 }
  0x20   :  { %136 = vmatpush.msra.mxu1 %v115_v19 }
  0x21   :  { %96 = vmatpush.msra.mxu0 %v73_v16 }
  0x22   :  { %137 = vmatpush.msra.mxu1 %v114_v21 }
  0x23   :  { %97 = vmatpush.msra.mxu0 %v72_v18 }
  0x24   :  { %138 = vmatpush.msra.mxu1 %v113_v23 }
  0x25   :  { %98 = vmatpush.msra.mxu0 %v71_v20 }
  0x26   :  { %139 = vmatpush.msra.mxu1 %v112_v25 }
  0x27   :  { %99 = vmatpush.msra.mxu0 %v70_v22 }
  0x28   :  { %140 = vmatpush.msra.mxu1 %v111_v27 }
  0x29   :  { %100 = vmatpush.msra.mxu0 %v69_v24 }
  0x2a   :  { %141 = vmatpush.msra.mxu1 %v110_v30 }
  0x2b   :  { %101 = vmatpush.msra.mxu0 %v68_v26 }
  0x2c   :  { %142 = vmatpush.msra.mxu1 %v109_v31 }
  0x2d   :  { %102 = vmatpush.msra.mxu0 %v67_v28 }
  0x2e   :  { %103 = vmatmul.f32.vlgmr.msra.gmra.mxu0 %v66_v29  ;;  %143 = vmatpush.msra.mxu1 %v108_v32 }
  0xab   :  { %v104_v34 = vpop.f32.mrf.mxu0 }
  0xac   :  { %v105_v35 = vadd.f32 %v173_v33, %v104_v34 }
  0xae   :  { %v107_v36 = vmax.f32 %v105_v35, 0.0 }
  0xb0   :  { %144 = vmatmul.f32.vlgmr.msra.gmra.mxu1 %v107_v36 }
 0x12d   :  { %v145_v38 = vpop.f32.mrf.mxu1 }
 0x12e   :  { %v146_v39 = vadd.f32 %v174_v37, %v145_v38 }
 0x130   :  { %148 = vst [vmem:[#allocation8] sm:$0xff] %v146_v39 }
 0x131   :  { %159 = dma.vmem_to_hbm [thread:$0]  %s155_s12, 128, %s157_s15, [#allocation4]  }
 0x132   :  { %275 = dma.done.wait [#allocation4], 128  }
 0x133   :  { %276 = vsyncadd [#allocation4], 4294967168 }
 0x134   :  { %164 = vsyncpa [#allocation3], 1 }
 0x135   :  { %165 = vsyncpa [#allocation6], 1 }
 0x136   :  { %166 = vsyncpa [#allocation4], 1 }

</bundles_post_ra>
